<compile_context>
chip_gen: v7x
topology: tpu7x:2x2x1
jax: 0.10.0
libtpu: 0.0.40
codegen_flags: <defaults>
</compile_context>

<pallas_src>
import jax
import jax.numpy as jnp
from jax.experimental import pallas as pl
from jax.experimental.pallas import tpu as pltpu

LANE = 128
SUBLANE = 8


def _round_up(x, m):
    return ((x + m - 1) // m) * m


def _linear_kernel(x_ref, w_ref, b_ref, o_ref):
    """o = x @ w + b for one (tile_m, tile_n) output tile; f32 MXU accumulation."""
    acc = jnp.dot(x_ref[...], w_ref[...], preferred_element_type=jnp.float32)
    acc = acc + b_ref[...].astype(jnp.float32)
    o_ref[...] = acc.astype(o_ref.dtype)


def slot_classifier_forward(x, weight, bias, *, tile_m=128, tile_n=128):
    """SlotClassifier.forward(x) = Linear(dropout(x)).

    x:      (..., input_dim)            float32
    weight: (num_slot_labels, input_dim) PyTorch nn.Linear layout
    bias:   (num_slot_labels,)
    returns (..., num_slot_labels)
    """
    *lead, K = x.shape
    N = weight.shape[0]
    assert weight.shape == (N, K)

    M = 1
    for d in lead:
        M *= d
    xf = x.reshape(M, K).astype(jnp.float32)

    # Pad token axis to a sublane/tile multiple and the label axis to a lane-dense
    # multiple of 128; zero padding does not change the valid logits.
    M_pad = _round_up(max(M, SUBLANE), SUBLANE)
    tm = min(tile_m, M_pad)
    M_pad = _round_up(M_pad, tm)

    N_pad = _round_up(max(N, LANE), LANE)
    tn = min(tile_n, N_pad)
    N_pad = _round_up(N_pad, tn)

    xp = jnp.zeros((M_pad, K), jnp.float32).at[:M, :].set(xf)
    # x @ W^T + b  ->  x @ Wt + b  with Wt = weight.T zero-padded along N.
    wp = jnp.zeros((K, N_pad), jnp.float32).at[:, :N].set(weight.T.astype(jnp.float32))
    bp = jnp.zeros((1, N_pad), jnp.float32).at[0, :N].set(bias.astype(jnp.float32))

    grid = (M_pad // tm, N_pad // tn)

    out = pl.pallas_call(
        _linear_kernel,
        out_shape=jax.ShapeDtypeStruct((M_pad, N_pad), jnp.float32),
        grid=grid,
        in_specs=[
            pl.BlockSpec((tm, K), lambda i, j: (i, 0)),   # activations tile
            pl.BlockSpec((K, tn), lambda i, j: (0, j)),   # weight column tile
            pl.BlockSpec((1, tn), lambda i, j: (0, j)),   # bias column tile
        ],
        out_specs=pl.BlockSpec((tm, tn), lambda i, j: (i, j)),
        compiler_params=pltpu.CompilerParams(
            dimension_semantics=("parallel", "parallel")),
    )(xp, wp, bp)

    return out[:M, :N].reshape(*lead, N)


if __name__ == "__main__":
    # Small shapes consistent with the module's use in TFToIntent:
    # sequence features (B, S, D_MODEL) -> per-token slot logits.
    B, S, D = 2, 8, 768
    NUM_SLOT_LABELS = 7

    root = jax.random.PRNGKey(0)
    kx, kw, kb = jax.random.split(root, 3)

    x = jax.random.normal(kx, (B, S, D), dtype=jnp.float32)
    # PyTorch nn.Linear default init: U(-1/sqrt(in), 1/sqrt(in))
    bound = 1.0 / jnp.sqrt(jnp.float32(D))
    weight = jax.random.uniform(kw, (NUM_SLOT_LABELS, D), jnp.float32, -bound, bound)
    bias = jax.random.uniform(kb, (NUM_SLOT_LABELS,), jnp.float32, -bound, bound)

    logits = slot_classifier_forward(x, weight, bias)
    logits = jax.block_until_ready(logits)

    assert logits.shape == (B, S, NUM_SLOT_LABELS)

    # Reference check (dropout p=0.0 is identity): x @ W^T + b
    ref = jnp.einsum("bsd,nd->bsn", x, weight) + bias
    assert jnp.allclose(logits, ref, atol=1e-4, rtol=1e-4)
    assert bool(jnp.all(jnp.isfinite(logits)))

    print("KERNEL_OK")
</pallas_src>

<mosaic_0001>
module attributes {stable_mosaic.version = 11 : i64} {
  func.func @_linear_kernel(%arg0: i32, %arg1: i32, %arg2: memref<16x768xf32, #tpu.memory_space<vmem>>, %arg3: memref<768x128xf32, #tpu.memory_space<vmem>>, %arg4: memref<1x128xf32, #tpu.memory_space<vmem>>, %arg5: memref<16x128xf32, #tpu.memory_space<vmem>>) attributes {dimension_semantics = [#tpu.dimension_semantics<parallel>, #tpu.dimension_semantics<parallel>], iteration_bounds = array<i64: 1, 1>, scalar_prefetch = 0 : i64, scratch_operands = 0 : i64, tpu.core_type = #tpu.core_type<tc>, window_params = [{transform_indices = @transform_0, window_bounds = array<i64: 16, 768>}, {transform_indices = @transform_1, window_bounds = array<i64: 768, 128>}, {transform_indices = @transform_2, window_bounds = array<i64: 1, 128>}, {transform_indices = @transform_3, window_bounds = array<i64: 16, 128>}]} {
    %c0 = arith.constant 0 : index
    %c0_0 = arith.constant 0 : index
    %0 = vector.load %arg2[%c0, %c0_0] : memref<16x768xf32, #tpu.memory_space<vmem>>, vector<16x768xf32>
    %c0_1 = arith.constant 0 : index
    %c0_2 = arith.constant 0 : index
    %1 = vector.load %arg3[%c0_1, %c0_2] : memref<768x128xf32, #tpu.memory_space<vmem>>, vector<768x128xf32>
    %cst = arith.constant dense<0.000000e+00> : vector<16x128xf32>
    %2 = tpu.matmul %0, %1, %cst {dimension_numbers = #tpu.dot_dimension_numbers<[1], [0], [0], [1], [0, 0, 1, 1], [], []>} : vector<16x768xf32>, vector<768x128xf32>, vector<16x128xf32> -> vector<16x128xf32>
    %c0_3 = arith.constant 0 : index
    %c0_4 = arith.constant 0 : index
    %3 = vector.load %arg4[%c0_3, %c0_4] : memref<1x128xf32, #tpu.memory_space<vmem>>, vector<1x128xf32>
    %4 = vector.broadcast %3 : vector<1x128xf32> to vector<16x128xf32>
    %5 = arith.addf %2, %4 : vector<16x128xf32>
    %c0_5 = arith.constant 0 : index
    %c0_6 = arith.constant 0 : index
    %6 = vector.load %arg5[%c0_5, %c0_6] : memref<16x128xf32, #tpu.memory_space<vmem>>, vector<16x128xf32>
    tpu.vector_store %arg5[%c0_5, %c0_6], %5 {strides = array<i32>} : memref<16x128xf32, #tpu.memory_space<vmem>>, vector<16x128xf32>,
    return
  }
  func.func @transform_0(%arg0: i32, %arg1: i32) -> (i32, i32) {
    %c0_i32 = arith.constant 0 : i32
    %c0_i32_0 = arith.constant 0 : i32
    return %arg0, %c0_i32 : i32, i32
  }
  func.func @transform_1(%arg0: i32, %arg1: i32) -> (i32, i32) {
    %c0_i32 = arith.constant 0 : i32
    %c0_i32_0 = arith.constant 0 : i32
    return %c0_i32, %arg1 : i32, i32
  }
  func.func @transform_2(%arg0: i32, %arg1: i32) -> (i32, i32) {
    %c0_i32 = arith.constant 0 : i32
    %c0_i32_0 = arith.constant 0 : i32
    return %c0_i32, %arg1 : i32, i32
  }
  func.func @transform_3(%arg0: i32, %arg1: i32) -> (i32, i32) {
    %c0_i32 = arith.constant 0 : i32
    return %arg0, %arg1 : i32, i32
  }
}

</mosaic_0001>

<bundles_post_ra>
// kernel: tpu_custom_call.1
= control target key start
LH: loop header
LB: loop body
LE: loop exit
PB: predicated region body
PF: predicated region fallthrough
CT: control target
= control target key end

     0   :  { %8 = vsyncpa [#allocation3], 0  ;;  %s781_s0 = inlined_call_operand.hbm [shape: f32[16,768], index: 0, kind: input, shape index: {}]   ;;  %s782_s1 = inlined_call_operand.hbm [shape: f32[768,128], index: 1, kind: input, shape index: {}]   ;;  %s783_s2 = inlined_call_operand.vmem [shape: f32[1,128], index: 2, kind: input, shape index: {}]   ;;  %s784_s3 = inlined_call_operand.hbm [shape: f32[16,128], index: 3, kind: output, shape index: {}]  }
   0x1   :  { %9 = vsyncpa [#allocation6], 0 }
   0x2   :  { %10 = vsyncpa [#allocation4], 0  ;;  %s709_s12 = smov [#allocation2]   ;;  %s637_s16 = scalar_lea.hbm %s781_s0, 1536 }
   0x3   :  { %s16_s13 = sshll.u32 %s709_s12, 4  ;;  %p638_p0 = scmp.ne.s32.totalorder %s781_s0, %s637_s16  ;;  %s17_s13 = int_to_ptr.vmem [resolvable:$true] %s16_s13 }
   0x4   :  { %p641_p1 = scmp.lt.u32.totalorder %s637_s16, %s781_s0 }
   0x6   :  { %p643_p2 = pnand %p641_p1, %p638_p0 }
   0x8   :  { %646 = shalt.err (!%p643_p2)
}
   0x9   :  { %s647_s21 = scalar_lea.vmem %s17_s13, 1536  ;;  %p652_p4 = scmp.lt.s32.totalorder %s17_s13, %s17_s13 }
   0xa   :  { %p648_p3 = scmp.ne.s32.totalorder %s17_s13, %s647_s21  ;;  %p653_p5 = scmp.lt.s32.totalorder %s647_s21, %s647_s21 }
   0xc   :  { %p654_p6 = por %p653_p5, %p652_p4 }
   0xe   :  { %p655_p7 = pnand %p654_p6, %p648_p3 }
  0x10   :  { %658 = shalt.err (!%p655_p7)
}
  0x11   :  { %s710_s22 = smov 768   ;;  %s711_s23 = smov 48  }
  0x12   :  { %22 = dma.hbm_to_vmem [thread:$0]  %s781_s0, 1536, %s17_s13, [#allocation3], %s710_s22, %s710_s22, %s711_s23  }
  0x13   :  { %s712_s26 = smov [#allocation5]   ;;  %s659_s30 = scalar_lea.hbm %s782_s1, 12288 }
  0x14   :  { %s28_s27 = sshll.u32 %s712_s26, 4  ;;  %p660_p8 = scmp.ne.s32.totalorder %s782_s1, %s659_s30  ;;  %s29_s27 = int_to_ptr.vmem [resolvable:$true] %s28_s27 }
  0x15   :  { %p663_p9 = scmp.lt.u32.totalorder %s659_s30, %s782_s1 }
  0x17   :  { %p665_p10 = pnand %p663_p9, %p660_p8 }
  0x19   :  { %668 = shalt.err (!%p665_p10)
}
  0x1a   :  { %s669_s8 = scalar_lea.vmem %s29_s27, 12288  ;;  %p674_p12 = scmp.lt.s32.totalorder %s29_s27, %s29_s27 }
  0x1b   :  { %p670_p11 = scmp.ne.s32.totalorder %s29_s27, %s669_s8  ;;  %p675_p13 = scmp.lt.s32.totalorder %s669_s8, %s669_s8 }
  0x1d   :  { %p676_p0 = por %p675_p13, %p674_p12 }
  0x1f   :  { %p677_p1 = pnand %p676_p0, %p670_p11 }
  0x21   :  { %680 = shalt.err (!%p677_p1)
}
  0x22   :  { %s713_s0 = smov 128   ;;  %s714_s9 = smov 8  }
  0x23   :  { %34 = dma.hbm_to_vmem [thread:$0]  %s782_s1, 12288, %s29_s27, [#allocation6], %s713_s0, %s713_s0, %s714_s9  }
  0x24   :  { %703 = dma.done.wait [#allocation3], 1536  }
  0x25   :  { %704 = vsyncadd [#allocation3], 4294965760 }
  0x26   :  { %705 = dma.done.wait [#allocation6], 12288  }
  0x27   :  { %706 = vsyncadd [#allocation6], 4294955008  ;;  %v71_v0 = vld [vmem:[#allocation5 + $0x80] sm:$0xff]  ;;  %v72_v1 = vld [vmem:[#allocation5 + $0x88] sm:$0xff] }
  0x28   :  { %v103_v2 = vld [vmem:[#allocation5 + $0x180] sm:$0xff]  ;;  %v518_v3 = vpack.c.bf16 %v72_v1, %v71_v0  ;;  %v104_v4 = vld [vmem:[#allocation5 + $0x188] sm:$0xff]  ;;  %v73_v11 = vld [vmem:[#allocation5 + $0x90] sm:$0xff] }
  0x29   :  { %v55_v5 = vld [vmem:[#allocation5] sm:$0xff]  ;;  %v56_v6 = vld [vmem:[#allocation5 + $0x8] sm:$0xff]  ;;  %v550_v7 = vpack.c.bf16 %v104_v4, %v103_v2  ;;  %v74_v13 = vld [vmem:[#allocation5 + $0x98] sm:$0xff] }
  0x2a   :  { %v520_v8 = vpack.c.bf16 %v56_v6, %v55_v5  ;;  %v87_v9 = vld [vmem:[#allocation5 + $0x100] sm:$0xff]  ;;  %v88_v10 = vld [vmem:[#allocation5 + $0x108] sm:$0xff]  ;;  %519 = vmatprep.subr.bf16.mxu0 %v518_v3  ;;  %v105_v14 = vld [vmem:[#allocation5 + $0x190] sm:$0xff]  ;;  %v522_v16 = vpack.c.bf16 %v74_v13, %v73_v11 }
  0x2b   :  { %v552_v12 = vpack.c.bf16 %v88_v10, %v87_v9  ;;  %v106_v15 = vld [vmem:[#allocation5 + $0x198] sm:$0xff]  ;;  %551 = vmatprep.subr.bf16.mxu1 %v550_v7  ;;  %v57_v18 = vld [vmem:[#allocation5 + $0x10] sm:$0xff]  ;;  %v75_v23 = vld [vmem:[#allocation5 + $0xa0] sm:$0xff] }
  0x2c   :  { %521 = vmatpush3.bf16.msra.mxu0 %v520_v8  ;;  %v554_v17 = vpack.c.bf16 %v106_v15, %v105_v14  ;;  %v58_v19 = vld [vmem:[#allocation5 + $0x18] sm:$0xff]  ;;  %v89_v20 = vld [vmem:[#allocation5 + $0x110] sm:$0xff]  ;;  %v76_v24 = vld [vmem:[#allocation5 + $0xa8] sm:$0xff] }
  0x2d   :  { %553 = vmatpush3.bf16.msra.mxu1 %v552_v12  ;;  %v524_v21 = vpack.c.bf16 %v58_v19, %v57_v18  ;;  %v90_v22 = vld [vmem:[#allocation5 + $0x118] sm:$0xff]  ;;  %523 = vmatprep.subr.bf16.mxu0 %v522_v16  ;;  %v526_v26 = vpack.c.bf16 %v76_v24, %v75_v23  ;;  %v107_v27 = vld [vmem:[#allocation5 + $0x1a0] sm:$0xff]  ;;  %v108_v28 = vld [vmem:[#allocation5 + $0x1a8] sm:$0xff] }
  0x2e   :  { %555 = vmatprep.subr.bf16.mxu1 %v554_v17  ;;  %v556_v25 = vpack.c.bf16 %v90_v22, %v89_v20  ;;  %v59_v29 = vld [vmem:[#allocation5 + $0x20] sm:$0xff]  ;;  %v558_v30 = vpack.c.bf16 %v108_v28, %v107_v27  ;;  %v60_v31 = vld [vmem:[#allocation5 + $0x28] sm:$0xff]  ;;  %v77_v35 = vld [vmem:[#allocation5 + $0xb0] sm:$0xff] }
  0x2f   :  { %v91_v32 = vld [vmem:[#allocation5 + $0x120] sm:$0xff]  ;;  %v92_v33 = vld [vmem:[#allocation5 + $0x128] sm:$0xff]  ;;  %v528_v34 = vpack.c.bf16 %v60_v31, %v59_v29  ;;  %v78_v36 = vld [vmem:[#allocation5 + $0xb8] sm:$0xff] }
  0x30   :  { %525 = vmatpush3.bf16.msra.mxu0 %v524_v21  ;;  %v109_v37 = vld [vmem:[#allocation5 + $0x1b0] sm:$0xff]  ;;  %v560_v38 = vpack.c.bf16 %v92_v33, %v91_v32  ;;  %v530_v39 = vpack.c.bf16 %v78_v36, %v77_v35  ;;  %v110_v40 = vld [vmem:[#allocation5 + $0x1b8] sm:$0xff]  ;;  %v79_v46 = vld [vmem:[#allocation5 + $0xc0] sm:$0xff] }
  0x31   :  { %557 = vmatpush3.bf16.msra.mxu1 %v556_v25  ;;  %527 = vmatprep.subr.bf16.mxu0 %v526_v26  ;;  %v61_v41 = vld [vmem:[#allocation5 + $0x30] sm:$0xff]  ;;  %v62_v42 = vld [vmem:[#allocation5 + $0x38] sm:$0xff]  ;;  %v562_v43 = vpack.c.bf16 %v110_v40, %v109_v37  ;;  %v80_v47 = vld [vmem:[#allocation5 + $0xc8] sm:$0xff] }
  0x32   :  { %559 = vmatprep.subr.bf16.mxu1 %v558_v30  ;;  %v93_v44 = vld [vmem:[#allocation5 + $0x130] sm:$0xff]  ;;  %v94_v45 = vld [vmem:[#allocation5 + $0x138] sm:$0xff]  ;;  %v111_v48 = vld [vmem:[#allocation5 + $0x1c0] sm:$0xff]  ;;  %v532_v50 = vpack.c.bf16 %v62_v42, %v61_v41  ;;  %v534_v52 = vpack.c.bf16 %v80_v47, %v79_v46 }
  0x33   :  { %v112_v49 = vld [vmem:[#allocation5 + $0x1c8] sm:$0xff]  ;;  %v564_v51 = vpack.c.bf16 %v94_v45, %v93_v44  ;;  %v63_v53 = vld [vmem:[#allocation5 + $0x40] sm:$0xff]  ;;  %v81_v58 = vld [vmem:[#allocation5 + $0xd0] sm:$0xff] }
  0x34   :  { %529 = vmatpush3.bf16.msra.mxu0 %v528_v34  ;;  %v64_v54 = vld [vmem:[#allocation5 + $0x48] sm:$0xff]  ;;  %v95_v55 = vld [vmem:[#allocation5 + $0x140] sm:$0xff]  ;;  %v566_v56 = vpack.c.bf16 %v112_v49, %v111_v48  ;;  %v82_v59 = vld [vmem:[#allocation5 + $0xd8] sm:$0xff] }
  0x35   :  { %561 = vmatpush3.bf16.msra.mxu1 %v560_v38  ;;  %531 = vmatprep.subr.bf16.mxu0 %v530_v39  ;;  %v96_v57 = vld [vmem:[#allocation5 + $0x148] sm:$0xff]  ;;  %v113_v60 = vld [vmem:[#allocation5 + $0x1d0] sm:$0xff]  ;;  %v114_v61 = vld [vmem:[#allocation5 + $0x1d8] sm:$0xff]  ;;  %v536_v62 = vpack.c.bf16 %v64_v54, %v63_v53  ;;  %v538_v0 = vpack.c.bf16 %v82_v59, %v81_v58 }
  0x36   :  { %563 = vmatprep.subr.bf16.mxu1 %v562_v43  ;;  %v568_v63 = vpack.c.bf16 %v96_v57, %v95_v55  ;;  %v65_v1 = vld [vmem:[#allocation5 + $0x50] sm:$0xff]  ;;  %v66_v2 = vld [vmem:[#allocation5 + $0x58] sm:$0xff]  ;;  %v570_v4 = vpack.c.bf16 %v114_v61, %v113_v60  ;;  %v83_v6 = vld [vmem:[#allocation5 + $0xe0] sm:$0xff] }
  0x37   :  { %v97_v3 = vld [vmem:[#allocation5 + $0x150] sm:$0xff]  ;;  %v98_v5 = vld [vmem:[#allocation5 + $0x158] sm:$0xff]  ;;  %v84_v7 = vld [vmem:[#allocation5 + $0xe8] sm:$0xff]  ;;  %v540_v10 = vpack.c.bf16 %v66_v2, %v65_v1 }
  0x38   :  { %533 = vmatpush3.bf16.msra.mxu0 %v532_v50  ;;  %v115_v8 = vld [vmem:[#allocation5 + $0x1e0] sm:$0xff]  ;;  %v116_v9 = vld [vmem:[#allocation5 + $0x1e8] sm:$0xff]  ;;  %v572_v13 = vpack.c.bf16 %v98_v5, %v97_v3  ;;  %v542_v14 = vpack.c.bf16 %v84_v7, %v83_v6  ;;  %v46_v17 = vld [vmem:[#allocation2 + $0x18] sm:$0xff] }
  0x39   :  { %565 = vmatpush3.bf16.msra.mxu1 %v564_v51  ;;  %535 = vmatprep.subr.bf16.mxu0 %v534_v52  ;;  %v67_v11 = vld [vmem:[#allocation5 + $0x60] sm:$0xff]  ;;  %v68_v12 = vld [vmem:[#allocation5 + $0x68] sm:$0xff]  ;;  %v574_v18 = vpack.c.bf16 %v116_v9, %v115_v8  ;;  %v85_v20 = vld [vmem:[#allocation5 + $0xf0] sm:$0xff] }
  0x3a   :  { %567 = vmatprep.subr.bf16.mxu1 %v566_v56  ;;  %v99_v15 = vld [vmem:[#allocation5 + $0x160] sm:$0xff]  ;;  %v44_v16 = vld [vmem:[#allocation2 + $0x8] sm:$0xff]  ;;  %v86_v21 = vld [vmem:[#allocation5 + $0xf8] sm:$0xff]  ;;  %297 = vmatprep.mubr.f32.mxu1 %v46_v17  ;;  %v544_v24 = vpack.c.bf16 %v68_v12, %v67_v11 }
  0x3b   :  { %v100_v19 = vld [vmem:[#allocation5 + $0x168] sm:$0xff]  ;;  %222 = vmatprep.mubr.f32.mxu0 %v44_v16  ;;  %v117_v22 = vld [vmem:[#allocation5 + $0x1f0] sm:$0xff]  ;;  %v118_v23 = vld [vmem:[#allocation5 + $0x1f8] sm:$0xff]  ;;  %v546_v26 = vpack.c.bf16 %v86_v21, %v85_v20 }
  0x3c   :  { %537 = vmatpush3.bf16.msra.mxu0 %v536_v62  ;;  %v576_v25 = vpack.c.bf16 %v100_v19, %v99_v15  ;;  %v69_v27 = vld [vmem:[#allocation5 + $0x70] sm:$0xff]  ;;  %v70_v28 = vld [vmem:[#allocation5 + $0x78] sm:$0xff]  ;;  %v578_v30 = vpack.c.bf16 %v118_v23, %v117_v22  ;;  %v135_v32 = vld [vmem:[#allocation5 + $0x280] sm:$0xff] }
  0x3d   :  { %569 = vmatpush3.bf16.msra.mxu1 %v568_v63  ;;  %539 = vmatprep.subr.bf16.mxu0 %v538_v0  ;;  %v101_v29 = vld [vmem:[#allocation5 + $0x170] sm:$0xff]  ;;  %v102_v31 = vld [vmem:[#allocation5 + $0x178] sm:$0xff]  ;;  %v136_v33 = vld [vmem:[#allocation5 + $0x288] sm:$0xff]  ;;  %v548_v34 = vpack.c.bf16 %v70_v28, %v69_v27 }
  0x3e   :  { %571 = vmatprep.subr.bf16.mxu1 %v570_v4  ;;  %v580_v35 = vpack.c.bf16 %v102_v31, %v101_v29  ;;  %v582_v36 = vpack.c.bf16 %v136_v33, %v135_v32  ;;  %v119_v37 = vld [vmem:[#allocation5 + $0x200] sm:$0xff]  ;;  %v120_v38 = vld [vmem:[#allocation5 + $0x208] sm:$0xff]  ;;  %v137_v39 = vld [vmem:[#allocation5 + $0x290] sm:$0xff] }
  0x3f   :  { %v138_v40 = vld [vmem:[#allocation5 + $0x298] sm:$0xff]  ;;  %v43_v41 = vld [vmem:[#allocation2] sm:$0xff]  ;;  %v584_v42 = vpack.c.bf16 %v120_v38, %v119_v37  ;;  %v45_v43 = vld [vmem:[#allocation2 + $0x10] sm:$0xff] }
  0x40   :  { %541 = vmatpush3.bf16.msra.mxu0 %v540_v10  ;;  %v586_v44 = vpack.c.bf16 %v138_v40, %v137_v39  ;;  %v121_v45 = vld [vmem:[#allocation5 + $0x210] sm:$0xff]  ;;  %v122_v46 = vld [vmem:[#allocation5 + $0x218] sm:$0xff]  ;;  %v139_v47 = vld [vmem:[#allocation5 + $0x2a0] sm:$0xff] }
  0x41   :  { %573 = vmatpush3.bf16.msra.mxu1 %v572_v13  ;;  %543 = vmatprep.subr.bf16.mxu0 %v542_v14  ;;  %v140_v48 = vld [vmem:[#allocation5 + $0x2a8] sm:$0xff]  ;;  %v50_v49 = vld [vmem:[#allocation2 + $0x38] sm:$0xff]  ;;  %v588_v50 = vpack.c.bf16 %v122_v46, %v121_v45  ;;  %v49_v51 = vld [vmem:[#allocation2 + $0x30] sm:$0xff] }
  0x42   :  { %575 = vmatprep.subr.bf16.mxu1 %v574_v18  ;;  %v52_v52 = vld [vmem:[#allocation2 + $0x48] sm:$0xff]  ;;  %v590_v53 = vpack.c.bf16 %v140_v48, %v139_v47  ;;  %v123_v54 = vld [vmem:[#allocation5 + $0x220] sm:$0xff]  ;;  %v141_v57 = vld [vmem:[#allocation5 + $0x2b0] sm:$0xff] }
  0x43   :  { %v124_v55 = vld [vmem:[#allocation5 + $0x228] sm:$0xff]  ;;  %v51_v56 = vld [vmem:[#allocation2 + $0x40] sm:$0xff]  ;;  %v142_v58 = vld [vmem:[#allocation5 + $0x2b8] sm:$0xff] }
  0x44   :  { %545 = vmatpush3.bf16.msra.mxu0 %v544_v24  ;;  %v48_v59 = vld [vmem:[#allocation2 + $0x28] sm:$0xff]  ;;  %v592_v60 = vpack.c.bf16 %v124_v55, %v123_v54  ;;  %v54_v61 = vld [vmem:[#allocation2 + $0x58] sm:$0xff]  ;;  %v594_v62 = vpack.c.bf16 %v142_v58, %v141_v57  ;;  %v125_v63 = vld [vmem:[#allocation5 + $0x230] sm:$0xff] }
  0x45   :  { %577 = vmatpush3.bf16.msra.mxu1 %v576_v25  ;;  %547 = vmatprep.subr.bf16.mxu0 %v546_v26  ;;  %v126_v0 = vld [vmem:[#allocation5 + $0x238] sm:$0xff]  ;;  %v143_v1 = vld [vmem:[#allocation5 + $0x2c0] sm:$0xff]  ;;  %v144_v2 = vld [vmem:[#allocation5 + $0x2c8] sm:$0xff] }
  0x46   :  { %579 = vmatprep.subr.bf16.mxu1 %v578_v30  ;;  %v596_v3 = vpack.c.bf16 %v126_v0, %v125_v63  ;;  %v598_v4 = vpack.c.bf16 %v144_v2, %v143_v1  ;;  %v127_v5 = vld [vmem:[#allocation5 + $0x240] sm:$0xff]  ;;  %v128_v6 = vld [vmem:[#allocation5 + $0x248] sm:$0xff]  ;;  %v145_v7 = vld [vmem:[#allocation5 + $0x2d0] sm:$0xff] }
  0x47   :  { %v146_v8 = vld [vmem:[#allocation5 + $0x2d8] sm:$0xff]  ;;  %v600_v9 = vpack.c.bf16 %v128_v6, %v127_v5  ;;  %v129_v11 = vld [vmem:[#allocation5 + $0x250] sm:$0xff]  ;;  %v147_v13 = vld [vmem:[#allocation5 + $0x2e0] sm:$0xff] }
  0x48   :  { %549 = vmatpush3.bf16.msra.mxu0 %v548_v34  ;;  %v602_v10 = vpack.c.bf16 %v146_v8, %v145_v7  ;;  %v130_v12 = vld [vmem:[#allocation5 + $0x258] sm:$0xff]  ;;  %v148_v14 = vld [vmem:[#allocation5 + $0x2e8] sm:$0xff]  ;;  %v131_v17 = vld [vmem:[#allocation5 + $0x260] sm:$0xff] }
  0x49   :  { %581 = vmatpush3.bf16.msra.mxu1 %v580_v35  ;;  %583 = vmatprep.subr.bf16.mxu0 %v582_v36  ;;  %v604_v15 = vpack.c.bf16 %v130_v12, %v129_v11  ;;  %v606_v16 = vpack.c.bf16 %v148_v14, %v147_v13  ;;  %v132_v18 = vld [vmem:[#allocation5 + $0x268] sm:$0xff]  ;;  %v149_v19 = vld [vmem:[#allocation5 + $0x2f0] sm:$0xff]  ;;  %v150_v20 = vld [vmem:[#allocation5 + $0x2f8] sm:$0xff] }
  0x4a   :  { %614 = vmatprep.subr.bf16.mxu1 %v582_v36  ;;  %v608_v21 = vpack.c.bf16 %v132_v18, %v131_v17  ;;  %v610_v22 = vpack.c.bf16 %v150_v20, %v149_v19  ;;  %v133_v23 = vld [vmem:[#allocation5 + $0x270] sm:$0xff]  ;;  %v134_v24 = vld [vmem:[#allocation5 + $0x278] sm:$0xff]  ;;  %v47_v26 = vld [vmem:[#allocation2 + $0x20] sm:$0xff] }
  0x4b   :  { %223 = vmatmul.mubr.f32.vlgmr.msra.gmra.mrb[0].mxu0 %v43_v41  ;;  %v612_v25 = vpack.c.bf16 %v134_v24, %v133_v23  ;;  %v53_v27 = vld [vmem:[#allocation2 + $0x50] sm:$0xff]  ;;  %v403_v30 = vld [vmem:[%s783_s2] ss:$0 sm:$0xff]  ;;  %s715_s2 = smov [#allocation7]  }
  0x4c   :  { %298 = vmatmul.mubr.f32.vlgmr.msra.gmra.mrb[0].mxu1 %v45_v43  ;;  %585 = vmatpush3.bf16.msra.mxu0 %v584_v42  ;;  %s390_s13 = sshll.u32 %s715_s2, 4  ;;  %s391_s13 = int_to_ptr.vmem [resolvable:$true] %s390_s13 }
  0x4d   :  { %622 = vmatpush3.bf16.msra.mxu1 %v584_v42  ;;  %587 = vmatprep.subr.bf16.mxu0 %v586_v44  ;;  %s681_s14 = scalar_lea.vmem %s391_s13, 256  ;;  %p686_p3 = scmp.lt.s32.totalorder %s391_s13, %s391_s13 }
  0x4e   :  { %615 = vmatprep.subr.bf16.mxu1 %v586_v44  ;;  %227 = vmatprep.mubr.f32.mxu0 %v50_v49  ;;  %p682_p2 = scmp.ne.s32.totalorder %s391_s13, %s681_s14  ;;  %p687_p4 = scmp.lt.s32.totalorder %s681_s14, %s681_s14 }
  0x4f   :  { %228 = vmatmul.mubr.f32.gmra.mrb[2].mxu0 %v49_v51  ;;  %302 = vmatprep.mubr.f32.mxu1 %v52_v52 }
  0x50   :  { %589 = vmatpush3.bf16.msra.mxu0 %v588_v50  ;;  %303 = vmatmul.mubr.f32.gmra.mrb[2].mxu1 %v51_v56  ;;  %p688_p5 = por %p687_p4, %p686_p3 }
  0x51   :  { %623 = vmatpush3.bf16.msra.mxu1 %v588_v50  ;;  %591 = vmatprep.subr.bf16.mxu0 %v590_v53 }
  0x52   :  { %616 = vmatprep.subr.bf16.mxu1 %v590_v53  ;;  %372 = vmatprep.mubr.f32.mxu0 %v48_v59  ;;  %p689_p6 = pnand %p688_p5, %p682_p2 }
  0x53   :  { %377 = vmatprep.mubr.f32.mxu1 %v54_v61 }
  0x54   :  { %593 = vmatpush3.bf16.msra.mxu0 %v592_v60 }
  0x55   :  { %624 = vmatpush3.bf16.msra.mxu1 %v592_v60  ;;  %595 = vmatprep.subr.bf16.mxu0 %v594_v62 }
  0x56   :  { %617 = vmatprep.subr.bf16.mxu1 %v594_v62 }
  0x58   :  { %597 = vmatpush3.bf16.msra.mxu0 %v596_v3 }
  0x59   :  { %625 = vmatpush3.bf16.msra.mxu1 %v596_v3  ;;  %599 = vmatprep.subr.bf16.mxu0 %v598_v4 }
  0x5a   :  { %618 = vmatprep.subr.bf16.mxu1 %v598_v4 }
  0x5c   :  { %601 = vmatpush3.bf16.msra.mxu0 %v600_v9 }
  0x5d   :  { %626 = vmatpush3.bf16.msra.mxu1 %v600_v9  ;;  %603 = vmatprep.subr.bf16.mxu0 %v602_v10 }
  0x5e   :  { %619 = vmatprep.subr.bf16.mxu1 %v602_v10 }
  0x60   :  { %605 = vmatpush3.bf16.msra.mxu0 %v604_v15 }
  0x61   :  { %627 = vmatpush3.bf16.msra.mxu1 %v604_v15  ;;  %607 = vmatprep.subr.bf16.mxu0 %v606_v16 }
  0x62   :  { %620 = vmatprep.subr.bf16.mxu1 %v606_v16 }
  0x64   :  { %609 = vmatpush3.bf16.msra.mxu0 %v608_v21 }
  0x65   :  { %628 = vmatpush3.bf16.msra.mxu1 %v608_v21  ;;  %611 = vmatprep.subr.bf16.mxu0 %v610_v22 }
  0x66   :  { %621 = vmatprep.subr.bf16.mxu1 %v610_v22 }
  0x68   :  { %613 = vmatpush3.bf16.msra.mxu0 %v612_v25 }
  0x69   :  { %629 = vmatpush3.bf16.msra.mxu1 %v612_v25 }
  0x6b   :  { %373 = vmatmul.mubr.f32.vlgmr.msra.gmra.mrb[4].mxu0 %v47_v26 }
  0x6c   :  { %378 = vmatmul.mubr.f32.vlgmr.msra.gmra.mrb[4].mxu1 %v53_v27 }
 0x11e   :  { %v436_v28 = vpop.f32.mrb[0].mxu0 }
 0x11f   :  { %v474_v29 = vpop.f32.mrb[0].mxu1  ;;  %v437_v31 = vpop.f32.mrb[1].mxu0 }
 0x120   :  { %v438_v32 = vadd.f32 %v437_v31, %v436_v28  ;;  %v475_v33 = vpop.f32.mrb[1].mxu1 }
 0x121   :  { %v476_v34 = vadd.f32 %v475_v33, %v474_v29 }
 0x122   :  { %v225_v35 = vadd.f32 %v438_v32, %v403_v30  ;;  %v439_v36 = vpop.f32.mrb[2].mxu0 }
 0x123   :  { %v440_v37 = vpop.f32.mrb[3].mxu0  ;;  %v477_v38 = vpop.f32.mrb[2].mxu1 }
 0x124   :  { %v300_v39 = vadd.f32 %v476_v34, %v225_v35  ;;  %v441_v40 = vadd.f32 %v440_v37, %v439_v36  ;;  %v478_v41 = vpop.f32.mrb[3].mxu1 }
 0x125   :  { %v479_v42 = vadd.f32 %v478_v41, %v477_v38 }
 0x126   :  { %v230_v43 = vadd.f32 %v441_v40, %v403_v30 }
 0x128   :  { %v305_v44 = vadd.f32 %v479_v42, %v230_v43 }
 0x13e   :  { %v512_v45 = vpop.f32.mrb[4].mxu0 }
 0x13f   :  { %v515_v46 = vpop.f32.mrb[4].mxu1  ;;  %v513_v47 = vpop.f32.mrb[5].mxu0 }
 0x140   :  { %v514_v48 = vadd.f32 %v513_v47, %v512_v45  ;;  %v516_v49 = vpop.f32.mrb[5].mxu1 }
 0x141   :  { %v517_v50 = vadd.f32 %v516_v49, %v515_v46 }
 0x142   :  { %v375_v51 = vadd.f32 %v514_v48, %v300_v39 }
 0x143   :  { %v380_v52 = vadd.f32 %v517_v50, %v305_v44 }
 0x144   :  { %383 = vst [vmem:[#allocation7] sm:$0xff] %v375_v51 }
 0x145   :  { %384 = vst [vmem:[#allocation7 + $0x8] sm:$0xff] %v380_v52 }
 0x146   :  { %692 = shalt.err (!%p689_p6)
}
 0x147   :  { %s693_s17 = scalar_lea.hbm %s784_s3, 256 }
 0x148   :  { %p694_p7 = scmp.ne.s32.totalorder %s784_s3, %s693_s17  ;;  %p697_p8 = scmp.lt.u32.totalorder %s693_s17, %s784_s3 }
 0x14a   :  { %p699_p9 = pnand %p697_p8, %p694_p7 }
 0x14c   :  { %702 = shalt.err (!%p699_p9)
}
 0x14d   :  { %396 = dma.vmem_to_hbm [thread:$0]  %s391_s13, 256, %s784_s3, [#allocation4], %s713_s0, %s713_s0, %s714_s9  }
 0x14e   :  { %707 = dma.done.wait [#allocation4], 256  }
 0x14f   :  { %708 = vsyncadd [#allocation4], 4294967040 }
 0x150   :  { %400 = vsyncpa [#allocation3], 1 }
 0x151   :  { %401 = vsyncpa [#allocation6], 1 }
 0x152   :  { %402 = vsyncpa [#allocation4], 1 }

</bundles_post_ra>
